<compile_context>
chip_gen: v5e
topology: v5e:2x2
jax: 0.10.0
libtpu: 0.0.40
codegen_flags: <defaults>
</compile_context>

<pallas_src>
import functools

import jax
import jax.numpy as jnp
from jax.experimental import pallas as pl
from jax.experimental.pallas import tpu as pltpu


def _dice_ce_kernel(x_ref, lab_ref, sp_ref, tp_ref, cnt_ref, ce_ref, iota_ref,
                    *, hw, tn, n_ch, n_tiles, half_tiles, need_mask, has_phantom):
    # x_ref:   (C, TN)  logits tile (native dtype), channels on sublanes, pixels on lanes
    # lab_ref: (1, TN)  int32 labels tile (lane-dense)
    # sp/tp/cnt_ref: (C, TN) f32 per-lane partial accumulators (this core's slice,
    #                resident across the b/i sub-grid)
    # ce_ref:  (1, TN)  f32 per-lane partial CE accumulator
    # iota_ref:(C, TN)  int32 channel-iota scratch (built once per core)
    core = pl.program_id(0)
    b = pl.program_id(1)
    i = pl.program_id(2)
    t = core * half_tiles + i            # global pixel-tile index for this step

    @pl.when((b == 0) & (i == 0))
    def _():
        sp_ref[...] = jnp.zeros_like(sp_ref)
        tp_ref[...] = jnp.zeros_like(tp_ref)
        cnt_ref[...] = jnp.zeros_like(cnt_ref)
        ce_ref[...] = jnp.zeros_like(ce_ref)
        # channel iota hoisted out of the hot loop into VMEM scratch
        iota_ref[...] = jax.lax.broadcasted_iota(jnp.int32, (n_ch, tn), 0)

    def accumulate(valid):
        logits = x_ref[...].astype(jnp.float32)        # (C, TN) — upcast in-kernel
        labels = lab_ref[...]                          # (1, TN) int32
        if valid is not None:
            # Mask BEFORE exp: out-of-bounds lanes of a partial boundary tile
            # carry unspecified garbage; Inf/NaN would survive a later *0.
            logits = jnp.where(valid, logits, 0.0)

        # numerically stable softmax over the channel (sublane) axis
        m = jnp.max(logits, axis=0, keepdims=True)     # (1, TN)  XLU
        e = jnp.exp(logits - m)                        # (C, TN)  EUP
        s = jnp.sum(e, axis=0, keepdims=True)          # (1, TN)  XLU
        p = e * pl.reciprocal(s, approx=False)         # (C, TN)

        # one-hot of labels along the channel (sublane) axis
        onehot = (iota_ref[...] == labels).astype(jnp.float32)   # (C, TN)
        if valid is not None:
            vf = valid.astype(jnp.float32)
            onehot = onehot * vf
            p = p * vf

        p_onehot = p * onehot                          # reused for tp AND CE
        p_lab = jnp.sum(p_onehot, axis=0, keepdims=True)   # (1, TN) = softmax[label]
        if valid is not None:
            p_lab = jnp.where(valid, p_lab, 1.0)       # log(1) = 0 on padded lanes
        # CE element: -log softmax[label].  Slightly less robust than the
        # log-sum-exp form for extreme-magnitude logits (verified vs reference).
        ce_elem = -jnp.log(p_lab)                      # (1, TN)  EUP

        # elementwise accumulation only — cross-lane reductions deferred to glue
        sp_ref[...] += p                 # sum_p[c]  -> fp = sum_p - tp
        tp_ref[...] += p_onehot          # tp[c]
        cnt_ref[...] += onehot           # count[c]  -> fn = count - tp
        ce_ref[...] += ce_elem           # CE sum

    if need_mask:
        # Only the LAST pixel tile can contain padding -> masked path only there.
        @pl.when(t == n_tiles - 1)
        def _():
            lane = jax.lax.broadcasted_iota(jnp.int32, (1, tn), 1)
            accumulate((t * tn + lane) < hw)

        @pl.when(t < n_tiles - 1)
        def _():
            accumulate(None)
    elif has_phantom:
        # Odd tile count: one core has a phantom (no-op) step at the end.
        @pl.when(t < n_tiles)
        def _():
            accumulate(None)
    else:
        accumulate(None)


def _round_up(x, m):
    return ((x + m - 1) // m) * m


@functools.partial(jax.jit,
                   static_argnames=("weight_ce", "weight_dice", "smooth", "tile_n"))
def dc_and_ce_loss(net_output, target, weight_ce=1.0, weight_dice=1.0,
                   smooth=1.0, tile_n=65536):
    """JAX/Pallas equivalent of DC_and_CE_loss(weight_ce=1, weight_dice=1).forward."""
    B, C, H, W = net_output.shape
    HW = H * W
    N = B * HW

    # Free, contiguous reshapes of NCHW — no transpose, no pad, no upcast.
    x3 = net_output.reshape(B, C, HW)                  # (B, C, HW)
    labels = target.reshape(B, 1, HW)                  # (B, 1, HW)
    if labels.dtype != jnp.int32:
        # NOTE: pass int32 targets to avoid this extra full-array cast in HBM.
        labels = labels.astype(jnp.int32)

    # Pixel tiling: big lane-aligned tiles, and at least 2 tiles whenever
    # possible so the 2-way TensorCore split has work for both cores.
    # No wrapper padding: the (possibly partial) last tile is masked in-kernel.
    tile_n = _round_up(max(int(tile_n), 128), 128)
    if HW < 256:
        tn = HW                                   # one full-extent tile (legal block)
    elif HW <= 2 * tile_n:
        tn = _round_up(pl.cdiv(HW, 2), 128)       # two tiles -> one per core
    else:
        tn = tile_n
    n_tiles = pl.cdiv(HW, tn)
    half_tiles = pl.cdiv(n_tiles, 2)              # pixel tiles per core
    need_mask = (HW % tn) != 0                    # only the last tile is partial
    has_phantom = (2 * half_tiles) != n_tiles     # odd tile count -> 1 idle step

    if has_phantom:
        pix = lambda c, i: jnp.minimum(c * half_tiles + i, n_tiles - 1)
    else:
        pix = lambda c, i: c * half_tiles + i

    kernel = functools.partial(
        _dice_ce_kernel, hw=HW, tn=tn, n_ch=C, n_tiles=n_tiles,
        half_tiles=half_tiles, need_mask=need_mask, has_phantom=has_phantom)

    # Per-core accumulator slices (leading axis = core), summed in the epilogue.
    out_shapes = (
        jax.ShapeDtypeStruct((2, C, tn), jnp.float32),   # sum_p partials
        jax.ShapeDtypeStruct((2, C, tn), jnp.float32),   # tp partials
        jax.ShapeDtypeStruct((2, C, tn), jnp.float32),   # onehot-count partials
        jax.ShapeDtypeStruct((2, 1, tn), jnp.float32),   # CE partials
    )
    acc_spec = pl.BlockSpec((None, C, tn), lambda c, b, i: (c, 0, 0))
    ce_spec = pl.BlockSpec((None, 1, tn), lambda c, b, i: (c, 0, 0))

    # Explicit VMEM budget: double-buffered inputs + double-buffered resident
    # accumulator slices + iota scratch, plus headroom — avoids tripping the
    # 32 MiB scoped default now that the pixel tile is large.
    in_block = C * tn * jnp.dtype(net_output.dtype).itemsize + tn * 4
    acc_block = (3 * C + 1) * tn * 4
    vmem_limit = int(2 * in_block + 2 * acc_block + C * tn * 4 + (8 << 20))

    sp, tp_acc, cnt, ce_acc = pl.pallas_call(
        kernel,
        out_shape=out_shapes,
        grid_spec=pltpu.PrefetchScalarGridSpec(
            num_scalar_prefetch=0,
            grid=(2, B, half_tiles),
            in_specs=[
                pl.BlockSpec((None, C, tn), lambda c, b, i: (b, 0, pix(c, i))),
                pl.BlockSpec((None, 1, tn), lambda c, b, i: (b, 0, pix(c, i))),
            ],
            out_specs=[acc_spec, acc_spec, acc_spec, ce_spec],
            scratch_shapes=[pltpu.VMEM((C, tn), jnp.int32)],
        ),
        compiler_params=pltpu.CompilerParams(
            dimension_semantics=("parallel", "arbitrary", "arbitrary"),
            vmem_limit_bytes=vmem_limit),
    )(x3, labels)

    # TODO(synk): optional (B,C,HW)->(B//2,2C,HW) sublane repack (full 8-sublane
    # occupancy for C=4, helps the compute-bound v7x path) — omitted to keep one
    # code path valid for odd B and across v5e/v6e/v7x.

    # Epilogue reductions + algebraic fp/fn in plain JAX (sums both core slices).
    sum_p = jnp.sum(sp, axis=(0, 2))       # (C,)
    tp = jnp.sum(tp_acc, axis=(0, 2))      # (C,)
    count = jnp.sum(cnt, axis=(0, 2))      # (C,)
    fp = sum_p - tp
    fn = count - tp

    # SoftDiceLossMultiClass: batch_dice=True, do_bg=False, smooth=1.0
    dc = (2.0 * tp + smooth) / (2.0 * tp + fp + fn + smooth)
    dc_loss = -jnp.mean(dc[1:])            # drop background class (index 0)

    # nn.CrossEntropyLoss (reduction='mean' over all pixels)
    ce_loss = jnp.sum(ce_acc) / N

    return weight_ce * ce_loss + weight_dice * dc_loss


def _reference_loss(net_output, target, smooth=1.0):
    """Pure-JAX reference mirroring the PyTorch module (for verification)."""
    B, C, H, W = net_output.shape
    p = jax.nn.softmax(net_output.astype(jnp.float32), axis=1)     # (B,C,H,W)
    y = jax.nn.one_hot(target[:, 0], C, axis=-1)                   # (B,H,W,C)
    y = jnp.transpose(y, (0, 3, 1, 2)).astype(jnp.float32)         # (B,C,H,W)
    axes = (0, 2, 3)
    tp = jnp.sum(p * y, axis=axes)
    fp = jnp.sum(p * (1 - y), axis=axes)
    fn = jnp.sum((1 - p) * y, axis=axes)
    dc = (2 * tp + smooth) / (2 * tp + fp + fn + smooth)
    dc_loss = -jnp.mean(dc[1:])
    logp = jax.nn.log_softmax(net_output.astype(jnp.float32), axis=1)
    lab = target[:, 0].astype(jnp.int32)
    ce = -jnp.mean(jnp.take_along_axis(logp, lab[:, None], axis=1)[:, 0])
    return ce + dc_loss


if __name__ == "__main__":
    key = jax.random.PRNGKey(0)

    # Three small cases to exercise all tiling paths:
    #   (2,4,16,16): HW=256 -> two exact 128-px tiles, one per core, no mask
    #   (2,4,12,20): HW=240 -> single full-extent tile + phantom core-1 step
    #   (2,4,20,20): HW=400 -> two 256-px tiles, masked partial last tile
    cases = [(2, 4, 16, 16), (2, 4, 12, 20), (2, 4, 20, 20)]
    for idx, (B, C, H, W) in enumerate(cases):
        k1, k2 = jax.random.split(jax.random.fold_in(key, idx))
        net_output = jax.random.normal(k1, (B, C, H, W), dtype=jnp.float32)
        target = jax.random.randint(k2, (B, 1, H, W), 0, C, dtype=jnp.int32)

        loss = jax.block_until_ready(dc_and_ce_loss(net_output, target))
        ref = _reference_loss(net_output, target)
        assert jnp.allclose(loss, ref, rtol=1e-5, atol=1e-5), (idx, loss, ref)

    print("KERNEL_OK")
</pallas_src>

<mosaic_0001>
module attributes {stable_mosaic.version = 11 : i64} {
  func.func @_dice_ce_kernel(%arg0: i32, %arg1: i32, %arg2: i32, %arg3: memref<1x4x128xf32, #tpu.memory_space<vmem>>, %arg4: memref<1x1x128xi32, #tpu.memory_space<vmem>>, %arg5: memref<1x4x128xf32, #tpu.memory_space<vmem>>, %arg6: memref<1x4x128xf32, #tpu.memory_space<vmem>>, %arg7: memref<1x4x128xf32, #tpu.memory_space<vmem>>, %arg8: memref<1x1x128xf32, #tpu.memory_space<vmem>>, %arg9: memref<4x128xi32, #tpu.memory_space<vmem>>) attributes {dimension_semantics = [#tpu.dimension_semantics<parallel>, #tpu.dimension_semantics<arbitrary>, #tpu.dimension_semantics<arbitrary>], iteration_bounds = array<i64: 2, 2, 1>, scalar_prefetch = 0 : i64, scratch_operands = 1 : i64, tpu.core_type = #tpu.core_type<tc>, window_params = [{transform_indices = @transform_0, window_bounds = array<i64: 1, 4, 128>}, {transform_indices = @transform_1, window_bounds = array<i64: 1, 1, 128>}, {transform_indices = @transform_2, window_bounds = array<i64: 1, 4, 128>}, {transform_indices = @transform_3, window_bounds = array<i64: 1, 4, 128>}, {transform_indices = @transform_4, window_bounds = array<i64: 1, 4, 128>}, {transform_indices = @transform_5, window_bounds = array<i64: 1, 1, 128>}]} {
    %c0_i32 = arith.constant 0 : i32
    %0 = arith.cmpi eq, %arg1, %c0_i32 : i32
    %c0_i32_0 = arith.constant 0 : i32
    %1 = arith.cmpi eq, %arg2, %c0_i32_0 : i32
    %2 = arith.andi %0, %1 : i1
    %3 = arith.extui %2 : i1 to i32
    %c0_i32_1 = arith.constant 0 : i32
    %4 = arith.cmpi ne, %3, %c0_i32_1 : i32
    scf.if %4 {
      %cst_36 = arith.constant 0.000000e+00 : f32
      %54 = vector.broadcast %cst_36 : f32 to vector<4x128xf32>
      %c0_37 = arith.constant 0 : index
      %c0_38 = arith.constant 0 : index
      %c0_39 = arith.constant 0 : index
      %55 = vector.load %arg5[%c0_37, %c0_38, %c0_39] : memref<1x4x128xf32, #tpu.memory_space<vmem>>, vector<1x4x128xf32>
      %56 = vector.shape_cast %55 : vector<1x4x128xf32> to vector<4x128xf32>
      %57 = vector.shape_cast %54 : vector<4x128xf32> to vector<1x4x128xf32>
      tpu.vector_store %arg5[%c0_37, %c0_38, %c0_39], %57 {strides = array<i32>} : memref<1x4x128xf32, #tpu.memory_space<vmem>>, vector<1x4x128xf32>,
      %cst_40 = arith.constant 0.000000e+00 : f32
      %58 = vector.broadcast %cst_40 : f32 to vector<4x128xf32>
      %c0_41 = arith.constant 0 : index
      %c0_42 = arith.constant 0 : index
      %c0_43 = arith.constant 0 : index
      %59 = vector.load %arg6[%c0_41, %c0_42, %c0_43] : memref<1x4x128xf32, #tpu.memory_space<vmem>>, vector<1x4x128xf32>
      %60 = vector.shape_cast %59 : vector<1x4x128xf32> to vector<4x128xf32>
      %61 = vector.shape_cast %58 : vector<4x128xf32> to vector<1x4x128xf32>
      tpu.vector_store %arg6[%c0_41, %c0_42, %c0_43], %61 {strides = array<i32>} : memref<1x4x128xf32, #tpu.memory_space<vmem>>, vector<1x4x128xf32>,
      %cst_44 = arith.constant 0.000000e+00 : f32
      %62 = vector.broadcast %cst_44 : f32 to vector<4x128xf32>
      %c0_45 = arith.constant 0 : index
      %c0_46 = arith.constant 0 : index
      %c0_47 = arith.constant 0 : index
      %63 = vector.load %arg7[%c0_45, %c0_46, %c0_47] : memref<1x4x128xf32, #tpu.memory_space<vmem>>, vector<1x4x128xf32>
      %64 = vector.shape_cast %63 : vector<1x4x128xf32> to vector<4x128xf32>
      %65 = vector.shape_cast %62 : vector<4x128xf32> to vector<1x4x128xf32>
      tpu.vector_store %arg7[%c0_45, %c0_46, %c0_47], %65 {strides = array<i32>} : memref<1x4x128xf32, #tpu.memory_space<vmem>>, vector<1x4x128xf32>,
      %cst_48 = arith.constant 0.000000e+00 : f32
      %66 = vector.broadcast %cst_48 : f32 to vector<1x128xf32>
      %c0_49 = arith.constant 0 : index
      %c0_50 = arith.constant 0 : index
      %c0_51 = arith.constant 0 : index
      %67 = vector.load %arg8[%c0_49, %c0_50, %c0_51] : memref<1x1x128xf32, #tpu.memory_space<vmem>>, vector<1x1x128xf32>
      %68 = vector.shape_cast %67 : vector<1x1x128xf32> to vector<1x128xf32>
      %69 = vector.shape_cast %66 : vector<1x128xf32> to vector<1x1x128xf32>
      tpu.vector_store %arg8[%c0_49, %c0_50, %c0_51], %69 {strides = array<i32>} : memref<1x1x128xf32, #tpu.memory_space<vmem>>, vector<1x1x128xf32>,
      %70 = tpu.iota {dimensions = array<i32: 0>} : vector<4x128xi32>
      %c0_52 = arith.constant 0 : index
      %c0_53 = arith.constant 0 : index
      %71 = vector.load %arg9[%c0_52, %c0_53] : memref<4x128xi32, #tpu.memory_space<vmem>>, vector<4x128xi32>
      tpu.vector_store %arg9[%c0_52, %c0_53], %70 {strides = array<i32>} : memref<4x128xi32, #tpu.memory_space<vmem>>, vector<4x128xi32>,
    } else {
    }
    %c0 = arith.constant 0 : index
    %c0_2 = arith.constant 0 : index
    %c0_3 = arith.constant 0 : index
    %5 = vector.load %arg3[%c0, %c0_2, %c0_3] : memref<1x4x128xf32, #tpu.memory_space<vmem>>, vector<1x4x128xf32>
    %6 = vector.shape_cast %5 : vector<1x4x128xf32> to vector<4x128xf32>
    %c0_4 = arith.constant 0 : index
    %c0_5 = arith.constant 0 : index
    %c0_6 = arith.constant 0 : index
    %7 = vector.load %arg4[%c0_4, %c0_5, %c0_6] : memref<1x1x128xi32, #tpu.memory_space<vmem>>, vector<1x1x128xi32>
    %8 = vector.shape_cast %7 : vector<1x1x128xi32> to vector<1x128xi32>
    %cst = arith.constant dense<0xFF800000> : vector<128xf32>
    %9 = vector.multi_reduction <maximumf>, %6, %cst [0] : vector<4x128xf32> to vector<128xf32>
    %10 = vector.shape_cast %9 : vector<128xf32> to vector<1x128xf32>
    %11 = vector.broadcast %10 : vector<1x128xf32> to vector<4x128xf32>
    %12 = arith.subf %6, %11 : vector<4x128xf32>
    %13 = math.exp %12 : vector<4x128xf32>
    %cst_7 = arith.constant dense<0.000000e+00> : vector<128xf32>
    %14 = vector.multi_reduction <add>, %13, %cst_7 [0] : vector<4x128xf32> to vector<128xf32>
    %15 = vector.shape_cast %14 : vector<128xf32> to vector<1x128xf32>
    %16 = tpu.reciprocal %15 : vector<1x128xf32> -> vector<1x128xf32>
    %17 = vector.broadcast %16 : vector<1x128xf32> to vector<4x128xf32>
    %18 = arith.mulf %13, %17 : vector<4x128xf32>
    %c0_8 = arith.constant 0 : index
    %c0_9 = arith.constant 0 : index
    %19 = vector.load %arg9[%c0_8, %c0_9] : memref<4x128xi32, #tpu.memory_space<vmem>>, vector<4x128xi32>
    %20 = vector.broadcast %8 : vector<1x128xi32> to vector<4x128xi32>
    %21 = arith.cmpi eq, %19, %20 : vector<4x128xi32>
    %22 = arith.extui %21 : vector<4x128xi1> to vector<4x128xi32>
    %23 = arith.sitofp %22 : vector<4x128xi32> to vector<4x128xf32>
    %24 = arith.mulf %18, %23 : vector<4x128xf32>
    %cst_10 = arith.constant dense<0.000000e+00> : vector<128xf32>
    %25 = vector.multi_reduction <add>, %24, %cst_10 [0] : vector<4x128xf32> to vector<128xf32>
    %26 = vector.shape_cast %25 : vector<128xf32> to vector<1x128xf32>
    %27 = math.log %26 : vector<1x128xf32>
    %cst_11 = arith.constant 0.000000e+00 : f32
    %28 = vector.broadcast %cst_11 : f32 to vector<1x128xf32>
    %29 = arith.subf %28, %27 : vector<1x128xf32>
    %c0_12 = arith.constant 0 : index
    %c0_13 = arith.constant 0 : index
    %c0_14 = arith.constant 0 : index
    %30 = vector.load %arg5[%c0_12, %c0_13, %c0_14] : memref<1x4x128xf32, #tpu.memory_space<vmem>>, vector<1x4x128xf32>
    %31 = vector.shape_cast %30 : vector<1x4x128xf32> to vector<4x128xf32>
    %32 = arith.addf %31, %18 : vector<4x128xf32>
    %c0_15 = arith.constant 0 : index
    %c0_16 = arith.constant 0 : index
    %c0_17 = arith.constant 0 : index
    %33 = vector.load %arg5[%c0_15, %c0_16, %c0_17] : memref<1x4x128xf32, #tpu.memory_space<vmem>>, vector<1x4x128xf32>
    %34 = vector.shape_cast %33 : vector<1x4x128xf32> to vector<4x128xf32>
    %35 = vector.shape_cast %32 : vector<4x128xf32> to vector<1x4x128xf32>
    tpu.vector_store %arg5[%c0_15, %c0_16, %c0_17], %35 {strides = array<i32>} : memref<1x4x128xf32, #tpu.memory_space<vmem>>, vector<1x4x128xf32>,
    %c0_18 = arith.constant 0 : index
    %c0_19 = arith.constant 0 : index
    %c0_20 = arith.constant 0 : index
    %36 = vector.load %arg6[%c0_18, %c0_19, %c0_20] : memref<1x4x128xf32, #tpu.memory_space<vmem>>, vector<1x4x128xf32>
    %37 = vector.shape_cast %36 : vector<1x4x128xf32> to vector<4x128xf32>
    %38 = arith.addf %37, %24 : vector<4x128xf32>
    %c0_21 = arith.constant 0 : index
    %c0_22 = arith.constant 0 : index
    %c0_23 = arith.constant 0 : index
    %39 = vector.load %arg6[%c0_21, %c0_22, %c0_23] : memref<1x4x128xf32, #tpu.memory_space<vmem>>, vector<1x4x128xf32>
    %40 = vector.shape_cast %39 : vector<1x4x128xf32> to vector<4x128xf32>
    %41 = vector.shape_cast %38 : vector<4x128xf32> to vector<1x4x128xf32>
    tpu.vector_store %arg6[%c0_21, %c0_22, %c0_23], %41 {strides = array<i32>} : memref<1x4x128xf32, #tpu.memory_space<vmem>>, vector<1x4x128xf32>,
    %c0_24 = arith.constant 0 : index
    %c0_25 = arith.constant 0 : index
    %c0_26 = arith.constant 0 : index
    %42 = vector.load %arg7[%c0_24, %c0_25, %c0_26] : memref<1x4x128xf32, #tpu.memory_space<vmem>>, vector<1x4x128xf32>
    %43 = vector.shape_cast %42 : vector<1x4x128xf32> to vector<4x128xf32>
    %44 = arith.addf %43, %23 : vector<4x128xf32>
    %c0_27 = arith.constant 0 : index
    %c0_28 = arith.constant 0 : index
    %c0_29 = arith.constant 0 : index
    %45 = vector.load %arg7[%c0_27, %c0_28, %c0_29] : memref<1x4x128xf32, #tpu.memory_space<vmem>>, vector<1x4x128xf32>
    %46 = vector.shape_cast %45 : vector<1x4x128xf32> to vector<4x128xf32>
    %47 = vector.shape_cast %44 : vector<4x128xf32> to vector<1x4x128xf32>
    tpu.vector_store %arg7[%c0_27, %c0_28, %c0_29], %47 {strides = array<i32>} : memref<1x4x128xf32, #tpu.memory_space<vmem>>, vector<1x4x128xf32>,
    %c0_30 = arith.constant 0 : index
    %c0_31 = arith.constant 0 : index
    %c0_32 = arith.constant 0 : index
    %48 = vector.load %arg8[%c0_30, %c0_31, %c0_32] : memref<1x1x128xf32, #tpu.memory_space<vmem>>, vector<1x1x128xf32>
    %49 = vector.shape_cast %48 : vector<1x1x128xf32> to vector<1x128xf32>
    %50 = arith.addf %49, %29 : vector<1x128xf32>
    %c0_33 = arith.constant 0 : index
    %c0_34 = arith.constant 0 : index
    %c0_35 = arith.constant 0 : index
    %51 = vector.load %arg8[%c0_33, %c0_34, %c0_35] : memref<1x1x128xf32, #tpu.memory_space<vmem>>, vector<1x1x128xf32>
    %52 = vector.shape_cast %51 : vector<1x1x128xf32> to vector<1x128xf32>
    %53 = vector.shape_cast %50 : vector<1x128xf32> to vector<1x1x128xf32>
    tpu.vector_store %arg8[%c0_33, %c0_34, %c0_35], %53 {strides = array<i32>} : memref<1x1x128xf32, #tpu.memory_space<vmem>>, vector<1x1x128xf32>,
    return
  }
  func.func @transform_0(%arg0: i32, %arg1: i32, %arg2: i32) -> (i32, i32, i32) {
    %c1_i32 = arith.constant 1 : i32
    %0 = arith.muli %arg0, %c1_i32 : i32
    %1 = arith.addi %0, %arg2 : i32
    %c0_i32 = arith.constant 0 : i32
    %c0_i32_0 = arith.constant 0 : i32
    return %arg1, %c0_i32, %1 : i32, i32, i32
  }
  func.func @transform_1(%arg0: i32, %arg1: i32, %arg2: i32) -> (i32, i32, i32) {
    %c1_i32 = arith.constant 1 : i32
    %0 = arith.muli %arg0, %c1_i32 : i32
    %1 = arith.addi %0, %arg2 : i32
    %c0_i32 = arith.constant 0 : i32
    %c0_i32_0 = arith.constant 0 : i32
    return %arg1, %c0_i32, %1 : i32, i32, i32
  }
  func.func @transform_2(%arg0: i32, %arg1: i32, %arg2: i32) -> (i32, i32, i32) {
    %c0_i32 = arith.constant 0 : i32
    %c0_i32_0 = arith.constant 0 : i32
    %c0_i32_1 = arith.constant 0 : i32
    return %arg0, %c0_i32, %c0_i32_0 : i32, i32, i32
  }
  func.func @transform_3(%arg0: i32, %arg1: i32, %arg2: i32) -> (i32, i32, i32) {
    %c0_i32 = arith.constant 0 : i32
    %c0_i32_0 = arith.constant 0 : i32
    %c0_i32_1 = arith.constant 0 : i32
    return %arg0, %c0_i32, %c0_i32_0 : i32, i32, i32
  }
  func.func @transform_4(%arg0: i32, %arg1: i32, %arg2: i32) -> (i32, i32, i32) {
    %c0_i32 = arith.constant 0 : i32
    %c0_i32_0 = arith.constant 0 : i32
    %c0_i32_1 = arith.constant 0 : i32
    return %arg0, %c0_i32, %c0_i32_0 : i32, i32, i32
  }
  func.func @transform_5(%arg0: i32, %arg1: i32, %arg2: i32) -> (i32, i32, i32) {
    %c0_i32 = arith.constant 0 : i32
    %c0_i32_0 = arith.constant 0 : i32
    %c0_i32_1 = arith.constant 0 : i32
    return %arg0, %c0_i32, %c0_i32_0 : i32, i32, i32
  }
}

</mosaic_0001>

<bundles_post_ra>
// kernel: dc_and_ce_loss.1
= control target key start
LH: loop header
LB: loop body
LE: loop exit
PB: predicated region body
PF: predicated region fallthrough
CT: control target
= control target key end

     0   :  { %s712_s18 = smov 0   ;;  %s714_s19 = smov 0   ;;  %s807_s0 = inlined_call_operand.vmem [shape: f32[2,4,256], index: 0, kind: input, shape index: {}]   ;;  %s808_s1 = inlined_call_operand.vmem [shape: s32[2,1,256], index: 1, kind: input, shape index: {}]   ;;  %s809_s2 = inlined_call_operand.vmem [shape: f32[2,4,128], index: 2, kind: output, shape index: {0}]   ;;  %s810_s3 = inlined_call_operand.vmem [shape: f32[2,4,128], index: 3, kind: output, shape index: {1}]   ;;  %s811_s4 = inlined_call_operand.vmem [shape: f32[2,4,128], index: 4, kind: output, shape index: {2}]   ;;  %s812_s5 = inlined_call_operand.vmem [shape: f32[2,1,128], index: 5, kind: output, shape index: {3}]  }
   0x1   :  { %s716_s20 = smov 0   ;;  %s718_s21 = smov 0  }
   0x2   :  { %s720_s22 = smov 0  }
   0x3 LB: > { %s31_s23 = sadd.s32 1, %s670_s20  ;;  %s35_s24 = sadd.s32 1, %s674_s21  ;;  %s678_s22 = sphi %s720_s22, %s16_s22   ;;  %s674_s21 = sphi %s718_s21, %s816_s21   ;;  %s670_s20 = sphi %s716_s20, %s815_s20   ;;  %s666_s19 = sphi %s714_s19, %s814_s19   ;;  %s662_s18 = sphi %s712_s18, %s813_s18  }
   0x4   : > { %p33_p0 = scmp.ge.s32.totalorder %s31_s23, 2  ;;  %p579_p1 = scmp.ge.s32.totalorder %s678_s22, 1 }
   0x5   : > { %p240_p2 = scmp.lt.s32.totalorder %s678_s22, 5 }
   0x6   : > { %s818_s23 = smov (%p33_p0, %s31_s23), 0  ;;  %s820_s24 = smov (!%p33_p0, %s35_s24), %s674_s21 }
   0x7   : > { %p241_p3 = pnand %p579_p1, %p240_p2  ;;  %p37_p4 = scmp.ge.s32.totalorder %s820_s24, 2 }
   0x8   : > { %p291_p5 = scmp.lt.s32.totalorder (!%p241_p3), %s662_s18, 1  ;;  %p293_p6 = scmp.lt.s32.totalorder (!%p241_p3), %s666_s19, 1 }
   0x9   : > { %s822_s24 = smov (%p37_p4, %s820_s24), 0  ;;  %244 = sbr.rel (%p241_p3) target bundleno = 111 (0x6f), region = 28 }
   0xa   : > { %p324_p7 = scmp.eq.s32.totalorder (!%p241_p3), %s662_s18, 0 }
   0xe   : > { %s824_s18 = smov (!%p291_p5, %s662_s18), 1  ;;  %s826_s19 = smov (!%p293_p6, %s666_s19), 1  ;;  %v334_v0 = vlaneseq (%p324_p7)  ;;  %v680_v1 = vmov (%p324_p7), 0.0  }
   0xf   : > { %s580_s25 = sshll.u32 %s824_s18, 1  ;;  %s583_s27 = sshll.u32 %s826_s19, 2 }
  0x10   : > { %s747_s26 = sadd.s32 %s580_s25, %s826_s19  ;;  %s760_s12 = scalar_lea.vmem %s809_s2, %s583_s27  ;;  %v335_v2 = vshrl.u32 (%p324_p7), %v334_v0, 7 }
  0x11   : > { %s581_s28 = sshll.u32 %s747_s26, 2  ;;  %s307_s6 = scalar_lea.vmem %s808_s1, %s747_s26  ;;  %330 = vst [vmem:[%s760_s12] sm:$0xf] (%p324_p7), %v680_v1 }
  0x12   : > { %s298_s9 = scalar_lea.vmem %s807_s0, %s581_s28  ;;  %s765_s15 = scalar_lea.vmem %s810_s3, %s583_s27  ;;  %336 = vst [vmem:[#allocation2] sm:$0xf] (%p324_p7), %v335_v2 }
  0x13   : > { %s770_s18 = scalar_lea.vmem %s811_s4, %s583_s27  ;;  %s775_s29 = scalar_lea.vmem %s812_s5, %s826_s19  ;;  %331 = vst [vmem:[%s765_s15] sm:$0xf] (%p324_p7), %v680_v1 }
  0x14   : > { %329 = sbr.rel (!%p324_p7) target bundleno = 25 (0x19), region = 32  ;;  %332 = vst [vmem:[%s770_s18] sm:$0xf] (%p324_p7), %v680_v1 }
  0x15   : > { %333 = vst [vmem:[%s775_s29] sm:$0x1] (%p324_p7), %v680_v1 }
  0x19 PF: > { %v337_v3 = vld [vmem:[%s298_s9] sm:$0xf]  ;;  %vm339_vm0 = vcmask 1043456   ;;  %v681_v21 = vmov 0.0  }
  0x1a   : > { %v340_v4 = vsel %vm339_vm0, %v337_v3, -inf  ;;  %v633_v15 = vld [vmem:[%s307_s6] ss:$0 sm:$0xff] }
  0x1b   : > { %v341_v5 = vrot.slane %v340_v4, 4  ;;  %v372_v17 = vld [vmem:[#allocation2] sm:$0xf] }
  0x1c   : > { %vm374_vm1 = vcmp.eq.s32.totalorder %v372_v17, %v633_v15  ;;  %v394_v23 = vld [vmem:[%s770_s18] sm:$0xf] }
  0x1d   : > { %v342_v6 = vmax.f32 %v340_v4, %v341_v5  ;;  %v587_v22 = vsel %vm374_vm1, 1.0, %v681_v21  ;;  %v388_v37 = vld [vmem:[%s760_s12] sm:$0xf] }
  0x1e   : > { %v395_v24 = vadd.f32 %v587_v22, %v394_v23  ;;  %v391_v39 = vld [vmem:[%s765_s15] sm:$0xf] }
  0x1f   : > { %v343_v7 = vrot.slane %v342_v6, 2  ;;  %v397_v52 = vld [vmem:[%s775_s29] sm:$0x1] }
  0x20   : > { %396 = vst [vmem:[%s770_s18] sm:$0xf] %v395_v24 }
  0x21   : > { %v344_v8 = vmax.f32 %v342_v6, %v343_v7 }
  0x23   : > { %v345_v9 = vrot.slane %v344_v8, 1 }
  0x25   : > { %v346_v10 = vmax.f32 %v344_v8, %v345_v9 }
  0x27   : > { %v347_v11 = vsub.f32 %v337_v3, %v346_v10 }
  0x29   : > { %v348_v12 = vmul.f32 1.442695, %v347_v11 }
  0x2b   : > { %634 = vpow2.f32 %v348_v12 }
  0x31   : > { %v635_v13 = vpop.eup %634 }
  0x32   : > { %v350_v14 = vsel %vm339_vm0, %v635_v13, 0.0 }
  0x33   : > { %v351_v16 = vrot.slane %v350_v14, 4 }
  0x35   : > { %v352_v18 = vadd.f32 %v351_v16, %v350_v14 }
  0x37   : > { %v353_v19 = vrot.slane %v352_v18, 2 }
  0x39   : > { %v354_v20 = vadd.f32 %v353_v19, %v352_v18 }
  0x3b   : > { %v355_v25 = vrot.slane %v354_v20, 1 }
  0x3d   : > { %v356_v26 = vadd.f32 %v355_v25, %v354_v20 }
  0x3f   : > { %636 = vrcp.f32 %v356_v26  ;;  %v368_v29 = vand.u32 2147483648, %v356_v26  ;;  %vm362_vm2 = vweird.f32 %v356_v26  ;;  %v366_v31 = vand.u32 2147483647, %v356_v26 }
  0x41   : > { %v369_v33 = vor.u32 1.1754944e-38, %v368_v29  ;;  %vm367_vm5 = vcmp.eq.f32.partialorder %v366_v31, 8.507059e+37 }
  0x45   : > { %v637_v27 = vpop.eup %636 }
  0x46   : > { %v358_v28 = vmul.f32 %v637_v27, %v356_v26  ;;  %vm363_vm3 = vweird.f32 %v637_v27 }
  0x47   : > { %vm364_vm4 = vmor %vm362_vm2, %vm363_vm3 }
  0x48   : > { %v359_v30 = vsub.f32 1.0, %v358_v28 }
  0x4a   : > { %v360_v32 = vmul.f32 %v637_v27, %v359_v30 }
  0x4c   : > { %v361_v34 = vadd.f32 %v637_v27, %v360_v32 }
  0x4e   : > { %v365_v35 = vsel %vm364_vm4, %v637_v27, %v361_v34 }
  0x4f   : > { %v370_v36 = vsel %vm367_vm5, %v369_v33, %v365_v35 }
  0x50   : > { %v371_v38 = vmul.f32 %v635_v13, %v370_v36 }
  0x52   : > { %v389_v40 = vadd.f32 %v388_v37, %v371_v38  ;;  %v377_v41 = vmul.f32 %v587_v22, %v371_v38 }
  0x54   : > { %390 = vst [vmem:[%s760_s12] sm:$0xf] %v389_v40  ;;  %v378_v42 = vsel %vm339_vm0, %v377_v41, 0.0  ;;  %v392_v43 = vadd.f32 %v391_v39, %v377_v41 }
  0x55   : > { %v379_v44 = vrot.slane %v378_v42, 4 }
  0x56   : > { %393 = vst [vmem:[%s765_s15] sm:$0xf] %v392_v43 }
  0x57   : > { %v380_v45 = vadd.f32 %v379_v44, %v378_v42 }
  0x59   : > { %v381_v46 = vrot.slane %v380_v45, 2 }
  0x5b   : > { %v382_v47 = vadd.f32 %v381_v46, %v380_v45 }
  0x5d   : > { %v383_v48 = vrot.slane %v382_v47, 1 }
  0x5f   : > { %v384_v49 = vadd.f32 %v383_v48, %v382_v47 }
  0x61   : > { %638 = vlog2.f32 %v384_v49 }
  0x67   : > { %v639_v50 = vpop.eup %638 }
  0x68   : > { %v386_v51 = vmul.f32 0.6931472, %v639_v50 }
  0x6a   : > { %v387_v53 = vsub.f32 0.0, %v386_v51 }
  0x6c   : > { %v398_v54 = vadd.f32 %v397_v52, %v387_v53 }
  0x6e   : > { %399 = vst [vmem:[%s775_s29] sm:$0x1] %v398_v54 }
  0x6f PF: > { %s16_s22 = sadd.s32 1, %s678_s22   ;;  %s813_s18 = smov %s670_s20 }
  0x70   : > { %p13_p8 = scmp.ge.s32.totalorder %s16_s22, 6   ;;  %s814_s19 = smov %s674_s21 }
  0x71   : > { %s815_s20 = smov %s818_s23  ;;  %s816_s21 = smov %s822_s24 }
  0x72   :  { %15 = sbr.rel (!%p13_p8) target bundleno = 3 (0x3), region = 101 }

</bundles_post_ra>
